<compile_context>
chip_gen: v5e
topology: v5e:2x2
jax: 0.10.0
libtpu: 0.0.40
codegen_flags: <defaults>
</compile_context>

<pallas_src>
import functools

import jax
import jax.numpy as jnp
from jax.experimental import pallas as pl
from jax.experimental.pallas import tpu as pltpu


def _round_up(v, m):
    return (v + m - 1) // m * m


def _lateral_block_kernel(x_ref, alphas_ref, mask_ref, w1t_ref, b1_ref,
                          w2t_ref, b2_ref, *rest, H, W, Nb, Cpi, Cpo,
                          has_lateral):
    """Nb batch elements of LateralBlock per grid step.

    x_ref   : (Nb, Cpi, PADLEN)  channel- and spatially-zero-padded input,
                                 padded rows flattened into lanes, stride W+2.
    alphas  : (2,) SMEM          PReLU alphas (a1, a2).
    mask    : (1, Nb*SPAN)       0/1 phantom-column mask.
    w*t     : (Cpo, 9*Cp)        im2col weights (tap-major, channel-minor),
                                 zero-padded K columns / M rows.
    o_ref   : (Nb, Cpo, SPAN)    output in padded-row-major coords
                                 (2 phantom cols per row, stripped in wrapper).
    pad_ref : (Cpo, Nb*PADLEN)   padded scratch for the mid activation.
    col_ref : (9*Cmax, Nb*SPAN)  shared im2col scratch.
    act_ref : (Cpi, Nb*PADLEN)   PReLU'd input plane (identity case only).
    """
    if has_lateral:
        wlt_ref, blt_ref, o_ref, pad_ref, col_ref = rest
    else:
        o_ref, pad_ref, col_ref, act_ref = rest

    Wp = W + 2
    SPAN = H * Wp
    PADLEN = (H + 3) * Wp

    a1 = alphas_ref[0]
    a2 = alphas_ref[1]
    mask = mask_ref[...]                                  # (1, Nb*SPAN)

    # ---- im2col pack of the input (+ first PReLU) ----------------------------
    if has_lateral:
        # The raw packed input is shared by the lateral conv and (after the
        # PReLU) by conv1, so pack raw x once and PReLU the packed matrix.
        for b in range(Nb):
            for kh in range(3):
                for kw in range(3):
                    t = kh * 3 + kw
                    off = kh * Wp + kw
                    col_ref[t * Cpi:(t + 1) * Cpi, b * SPAN:(b + 1) * SPAN] = \
                        x_ref[b, :, off:off + SPAN]
        col_x = col_ref[0:9 * Cpi, :]                     # (9*Cpi, Nb*SPAN)
        res = jnp.dot(wlt_ref[...], col_x,
                      preferred_element_type=jnp.float32) + blt_ref[...]
        h0 = jnp.where(col_x > 0, col_x, a1 * col_x)
    else:
        # Identity residual: PReLU once on the small plane (PReLU(0)==0 keeps
        # the zero padding), then pack -- ~9x fewer VPU ops for this stage.
        for b in range(Nb):
            xb = x_ref[b]                                 # (Cpi, PADLEN)
            act_ref[:, b * PADLEN:(b + 1) * PADLEN] = \
                jnp.where(xb > 0, xb, a1 * xb)
        for b in range(Nb):
            for kh in range(3):
                for kw in range(3):
                    t = kh * 3 + kw
                    off = kh * Wp + kw
                    col_ref[t * Cpi:(t + 1) * Cpi, b * SPAN:(b + 1) * SPAN] = \
                        act_ref[:, b * PADLEN + off:b * PADLEN + off + SPAN]
        h0 = col_ref[0:9 * Cpi, :]

    # ---- conv1 + second PReLU -------------------------------------------------
    h1 = jnp.dot(w1t_ref[...], h0,
                 preferred_element_type=jnp.float32) + b1_ref[...]
    h1 = jnp.where(h1 > 0, h1, a2 * h1)
    h1 = h1 * mask      # zero phantom cols so in-range pad cells land exact 0

    # Zero the two small border strips of each element's padded plane, then the
    # masked interior in one lane-dense store per element.  (Strips re-zeroed
    # every step on purpose: with a "parallel" batch axis each TensorCore has
    # its own scratch, so a program_id==0 one-time init would leave the second
    # core's scratch uninitialized on multi-TC chips.)
    for b in range(Nb):
        base = b * PADLEN
        pad_ref[:, base:base + Wp + 1] = jnp.zeros((Cpo, Wp + 1), jnp.float32)
        pad_ref[:, base + (H + 1) * Wp + 1:base + PADLEN] = jnp.zeros(
            (Cpo, 2 * Wp - 1), jnp.float32)
        pad_ref[:, base + Wp + 1:base + Wp + 1 + SPAN] = \
            h1[:, b * SPAN:(b + 1) * SPAN]

    # ---- conv2 over the padded intermediate ------------------------------------
    for b in range(Nb):
        for kh in range(3):
            for kw in range(3):
                t = kh * 3 + kw
                off = kh * Wp + kw
                col_ref[t * Cpo:(t + 1) * Cpo, b * SPAN:(b + 1) * SPAN] = \
                    pad_ref[:, b * PADLEN + off:b * PADLEN + off + SPAN]
    h2 = jnp.dot(w2t_ref[...], col_ref[0:9 * Cpo, :],
                 preferred_element_type=jnp.float32) + b2_ref[...]

    # ---- residual add + per-element lane-dense stores ---------------------------
    if has_lateral:
        out = h2 + res
        for b in range(Nb):
            o_ref[b] = out[:, b * SPAN:(b + 1) * SPAN].astype(o_ref.dtype)
    else:
        for b in range(Nb):
            o_ref[b] = (h2[:, b * SPAN:(b + 1) * SPAN]
                        + x_ref[b, :, Wp + 1:Wp + 1 + SPAN]).astype(o_ref.dtype)


def init_params(key, ch_in, ch_out):
    ks = jax.random.split(key, 6)
    params = {
        "a1": jnp.array(0.25, jnp.float32),   # nn.PReLU() default scalar init
        "a2": jnp.array(0.25, jnp.float32),
        "w1": 0.1 * jax.random.normal(ks[0], (ch_out, ch_in, 3, 3), jnp.float32),
        "b1": 0.1 * jax.random.normal(ks[1], (ch_out,), jnp.float32),
        "w2": 0.1 * jax.random.normal(ks[2], (ch_out, ch_out, 3, 3), jnp.float32),
        "b2": 0.1 * jax.random.normal(ks[3], (ch_out,), jnp.float32),
    }
    if ch_in != ch_out:
        params["wl"] = 0.1 * jax.random.normal(ks[4], (ch_out, ch_in, 3, 3),
                                               jnp.float32)
        params["bl"] = 0.1 * jax.random.normal(ks[5], (ch_out,), jnp.float32)
    return params


def lateral_block(params, x):
    """LateralBlock forward. x: (N, C_in, H, W) NCHW float32."""
    N, C_in, H, W = x.shape
    C_out = params["w1"].shape[0]
    has_lateral = (C_in != C_out)

    Cpi = _round_up(C_in, 8)
    Cpo = _round_up(C_out, 8)
    Wp = W + 2
    SPAN = H * Wp                 # output length incl. 2 phantom cols per row
    PADLEN = (H + 3) * Wp         # padded plane + spare rows for tap overreach

    # Fold Nb batch elements per grid step; keep >= 2 grid steps when the
    # batch allows so v7x's two TensorCores both get work.
    if N > 2 and N % 2 == 0:
        Nb = N // 2
    else:
        Nb = 1
    G = N // Nb

    # Pad channels to a sublane multiple (8) and spatial to (H+3, W+2) once in
    # the wrapper; flatten padded rows into the lane dim.
    xpad = jnp.pad(x.astype(jnp.float32),
                   ((0, 0), (0, Cpi - C_in), (1, 2), (1, 1))).reshape(
                       N, Cpi, PADLEN)

    def pack_w(w, cin):
        # (C_out, cin, 3, 3) -> (Cpo, 9*round_up(cin,8)); K row = t*cpad + ci.
        cpad = _round_up(cin, 8)
        wt = jnp.transpose(w, (0, 2, 3, 1))               # (C_out, 3, 3, cin)
        wt = jnp.pad(wt, ((0, Cpo - C_out), (0, 0), (0, 0), (0, cpad - cin)))
        return wt.reshape(Cpo, 9 * cpad)

    def pack_b(b):
        return jnp.pad(b, (0, Cpo - C_out)).reshape(Cpo, 1)

    w1t = pack_w(params["w1"], C_in)
    w2t = pack_w(params["w2"], C_out)
    b1 = pack_b(params["b1"])
    b2 = pack_b(params["b2"])
    alphas = jnp.stack([params["a1"], params["a2"]]).astype(jnp.float32)

    # Precomputed 0/1 phantom-column mask over the packed lane dim.
    col_in_row = jnp.arange(SPAN, dtype=jnp.int32) % Wp
    mask = jnp.tile((col_in_row < W).astype(jnp.float32), Nb).reshape(
        1, Nb * SPAN)

    in_specs = [
        pl.BlockSpec((Nb, Cpi, PADLEN), lambda n: (n, 0, 0)),
        pl.BlockSpec(memory_space=pltpu.MemorySpace.SMEM),        # alphas
        pl.BlockSpec((1, Nb * SPAN), lambda n: (0, 0)),           # mask
        pl.BlockSpec((Cpo, 9 * Cpi), lambda n: (0, 0)),
        pl.BlockSpec((Cpo, 1), lambda n: (0, 0)),
        pl.BlockSpec((Cpo, 9 * Cpo), lambda n: (0, 0)),
        pl.BlockSpec((Cpo, 1), lambda n: (0, 0)),
    ]
    args = [xpad, alphas, mask, w1t, b1, w2t, b2]
    scratch_shapes = [
        pltpu.VMEM((Cpo, Nb * PADLEN), jnp.float32),              # pad_ref
        pltpu.VMEM((9 * max(Cpi, Cpo), Nb * SPAN), jnp.float32),  # col_ref
    ]
    if has_lateral:
        in_specs += [pl.BlockSpec((Cpo, 9 * Cpi), lambda n: (0, 0)),
                     pl.BlockSpec((Cpo, 1), lambda n: (0, 0))]
        args += [pack_w(params["wl"], C_in), pack_b(params["bl"])]
    else:
        scratch_shapes += [pltpu.VMEM((Cpi, Nb * PADLEN), jnp.float32)]  # act

    kernel = functools.partial(_lateral_block_kernel, H=H, W=W, Nb=Nb,
                               Cpi=Cpi, Cpo=Cpo, has_lateral=has_lateral)

    # TODO(synk): for large H*W add a row-band grid axis (1-row halo); size the
    # band so col_ref + pad_ref + double-buffered in/out bands fit v7x's 64 MiB
    # VMEM and set vmem_limit_bytes explicitly (scoped default is 16/32 MiB on
    # v5e/v6e); unnecessary at these shapes.
    out_flat = pl.pallas_call(
        kernel,
        out_shape=jax.ShapeDtypeStruct((N, Cpo, SPAN), jnp.float32),
        grid_spec=pltpu.PrefetchScalarGridSpec(
            num_scalar_prefetch=0,
            grid=(G,),
            in_specs=in_specs,
            out_specs=pl.BlockSpec((Nb, Cpo, SPAN), lambda n: (n, 0, 0)),
            scratch_shapes=scratch_shapes,
        ),
        compiler_params=pltpu.CompilerParams(
            dimension_semantics=("parallel",)),
    )(*args)

    # Drop the 2 phantom columns per row and the padded channels; the
    # row-major reshape is free.
    return out_flat.reshape(N, Cpo, H, Wp)[:, :C_out, :, :W]


def _reference(params, x):
    """Pure-JAX reference of the PyTorch LateralBlock forward (NCHW)."""
    def prelu(v, a):
        return jnp.where(v > 0, v, a * v)

    def conv(v, w, b):
        y = jax.lax.conv_general_dilated(
            v, w, window_strides=(1, 1), padding="SAME",
            dimension_numbers=("NCHW", "OIHW", "NCHW"),
            precision=jax.lax.Precision.HIGHEST)
        return y + b[None, :, None, None]

    fx = conv(prelu(x, params["a1"]), params["w1"], params["b1"])
    fx = conv(prelu(fx, params["a2"]), params["w2"], params["b2"])
    if "wl" in params:
        x = conv(x, params["wl"], params["bl"])
    return fx + x


if __name__ == "__main__":
    key = jax.random.PRNGKey(0)
    kx, kp, kp2 = jax.random.split(key, 3)

    # Case 1: ch_in != ch_out -> lateral conv residual (Nb=1, grid=(2,)).
    N, ch_in, ch_out, H, W = 2, 4, 8, 16, 16
    x = jax.random.normal(kx, (N, ch_in, H, W), jnp.float32)
    params = init_params(kp, ch_in, ch_out)
    out = jax.block_until_ready(lateral_block(params, x))
    assert out.shape == (N, ch_out, H, W), out.shape
    err = float(jnp.max(jnp.abs(out - _reference(params, x))))
    assert err < 2e-3, f"case1 max abs error {err}"

    # Case 2: ch_in == ch_out -> identity residual (Nb=1, grid=(2,)).
    params2 = init_params(kp2, ch_out, ch_out)
    x2 = jax.random.normal(kx, (N, ch_out, H, W), jnp.float32)
    out2 = jax.block_until_ready(lateral_block(params2, x2))
    err2 = float(jnp.max(jnp.abs(out2 - _reference(params2, x2))))
    assert err2 < 2e-3, f"case2 max abs error {err2}"

    # Case 3: batched grid step (N=4 -> Nb=2, grid=(2,)), lateral residual.
    x3 = jax.random.normal(kx, (4, ch_in, H, W), jnp.float32)
    out3 = jax.block_until_ready(lateral_block(params, x3))
    err3 = float(jnp.max(jnp.abs(out3 - _reference(params, x3))))
    assert err3 < 2e-3, f"case3 max abs error {err3}"

    # Case 4: batched grid step (N=4 -> Nb=2, grid=(2,)), identity residual.
    x4 = jax.random.normal(kx, (4, ch_out, H, W), jnp.float32)
    out4 = jax.block_until_ready(lateral_block(params2, x4))
    err4 = float(jnp.max(jnp.abs(out4 - _reference(params2, x4))))
    assert err4 < 2e-3, f"case4 max abs error {err4}"

    print("KERNEL_OK")
</pallas_src>

<mosaic_0001>
module attributes {stable_mosaic.version = 11 : i64} {
  func.func @_lateral_block_kernel(%arg0: i32, %arg1: memref<1x8x342xf32, #tpu.memory_space<vmem>>, %arg2: memref<2xf32, #tpu.memory_space<smem>>, %arg3: memref<1x288xf32, #tpu.memory_space<vmem>>, %arg4: memref<8x72xf32, #tpu.memory_space<vmem>>, %arg5: memref<8x1xf32, #tpu.memory_space<vmem>>, %arg6: memref<8x72xf32, #tpu.memory_space<vmem>>, %arg7: memref<8x1xf32, #tpu.memory_space<vmem>>, %arg8: memref<8x72xf32, #tpu.memory_space<vmem>>, %arg9: memref<8x1xf32, #tpu.memory_space<vmem>>, %arg10: memref<1x8x288xf32, #tpu.memory_space<vmem>>, %arg11: memref<8x342xf32, #tpu.memory_space<vmem>>, %arg12: memref<72x288xf32, #tpu.memory_space<vmem>>) attributes {dimension_semantics = [#tpu.dimension_semantics<parallel>], iteration_bounds = array<i64: 2>, scalar_prefetch = 0 : i64, scratch_operands = 2 : i64, tpu.core_type = #tpu.core_type<tc>, window_params = [{transform_indices = @transform_0, window_bounds = array<i64: 1, 8, 342>}, {transform_indices = @transform_1, window_bounds = array<i64: 2>}, {pipeline_mode = #tpu.pipeline_mode<synchronous>, transform_indices = @transform_2, window_bounds = array<i64: 1, 288>}, {pipeline_mode = #tpu.pipeline_mode<synchronous>, transform_indices = @transform_3, window_bounds = array<i64: 8, 72>}, {pipeline_mode = #tpu.pipeline_mode<synchronous>, transform_indices = @transform_4, window_bounds = array<i64: 8, 1>}, {pipeline_mode = #tpu.pipeline_mode<synchronous>, transform_indices = @transform_5, window_bounds = array<i64: 8, 72>}, {pipeline_mode = #tpu.pipeline_mode<synchronous>, transform_indices = @transform_6, window_bounds = array<i64: 8, 1>}, {pipeline_mode = #tpu.pipeline_mode<synchronous>, transform_indices = @transform_7, window_bounds = array<i64: 8, 72>}, {pipeline_mode = #tpu.pipeline_mode<synchronous>, transform_indices = @transform_8, window_bounds = array<i64: 8, 1>}, {transform_indices = @transform_9, window_bounds = array<i64: 1, 8, 288>}]} {
    %c0 = arith.constant 0 : index
    %0 = memref.load %arg2[%c0] : memref<2xf32, #tpu.memory_space<smem>>
    %c1 = arith.constant 1 : index
    %1 = memref.load %arg2[%c1] : memref<2xf32, #tpu.memory_space<smem>>
    %c0_0 = arith.constant 0 : index
    %c0_1 = arith.constant 0 : index
    %2 = vector.load %arg3[%c0_0, %c0_1] : memref<1x288xf32, #tpu.memory_space<vmem>>, vector<1x288xf32>
    %c0_2 = arith.constant 0 : index
    %c0_3 = arith.constant 0 : index
    %c0_4 = arith.constant 0 : index
    %3 = vector.load %arg1[%c0_2, %c0_3, %c0_4] : memref<1x8x342xf32, #tpu.memory_space<vmem>>, vector<1x8x288xf32>
    %4 = vector.shape_cast %3 : vector<1x8x288xf32> to vector<8x288xf32>
    %c0_5 = arith.constant 0 : index
    %c0_6 = arith.constant 0 : index
    %5 = vector.load %arg12[%c0_5, %c0_6] : memref<72x288xf32, #tpu.memory_space<vmem>>, vector<8x288xf32>
    tpu.vector_store %arg12[%c0_5, %c0_6], %4 {strides = array<i32>} : memref<72x288xf32, #tpu.memory_space<vmem>>, vector<8x288xf32>,
    %c0_7 = arith.constant 0 : index
    %c0_8 = arith.constant 0 : index
    %c1_9 = arith.constant 1 : index
    %6 = vector.load %arg1[%c0_7, %c0_8, %c1_9] : memref<1x8x342xf32, #tpu.memory_space<vmem>>, vector<1x8x288xf32>
    %7 = vector.shape_cast %6 : vector<1x8x288xf32> to vector<8x288xf32>
    %c8 = arith.constant 8 : index
    %c0_10 = arith.constant 0 : index
    %8 = vector.load %arg12[%c8, %c0_10] : memref<72x288xf32, #tpu.memory_space<vmem>>, vector<8x288xf32>
    tpu.vector_store %arg12[%c8, %c0_10], %7 {strides = array<i32>} : memref<72x288xf32, #tpu.memory_space<vmem>>, vector<8x288xf32>,
    %c0_11 = arith.constant 0 : index
    %c0_12 = arith.constant 0 : index
    %c2 = arith.constant 2 : index
    %9 = vector.load %arg1[%c0_11, %c0_12, %c2] : memref<1x8x342xf32, #tpu.memory_space<vmem>>, vector<1x8x288xf32>
    %10 = vector.shape_cast %9 : vector<1x8x288xf32> to vector<8x288xf32>
    %c16 = arith.constant 16 : index
    %c0_13 = arith.constant 0 : index
    %11 = vector.load %arg12[%c16, %c0_13] : memref<72x288xf32, #tpu.memory_space<vmem>>, vector<8x288xf32>
    tpu.vector_store %arg12[%c16, %c0_13], %10 {strides = array<i32>} : memref<72x288xf32, #tpu.memory_space<vmem>>, vector<8x288xf32>,
    %c0_14 = arith.constant 0 : index
    %c0_15 = arith.constant 0 : index
    %c18 = arith.constant 18 : index
    %12 = vector.load %arg1[%c0_14, %c0_15, %c18] : memref<1x8x342xf32, #tpu.memory_space<vmem>>, vector<1x8x288xf32>
    %13 = vector.shape_cast %12 : vector<1x8x288xf32> to vector<8x288xf32>
    %c24 = arith.constant 24 : index
    %c0_16 = arith.constant 0 : index
    %14 = vector.load %arg12[%c24, %c0_16] : memref<72x288xf32, #tpu.memory_space<vmem>>, vector<8x288xf32>
    tpu.vector_store %arg12[%c24, %c0_16], %13 {strides = array<i32>} : memref<72x288xf32, #tpu.memory_space<vmem>>, vector<8x288xf32>,
    %c0_17 = arith.constant 0 : index
    %c0_18 = arith.constant 0 : index
    %c19 = arith.constant 19 : index
    %15 = vector.load %arg1[%c0_17, %c0_18, %c19] : memref<1x8x342xf32, #tpu.memory_space<vmem>>, vector<1x8x288xf32>
    %16 = vector.shape_cast %15 : vector<1x8x288xf32> to vector<8x288xf32>
    %c32 = arith.constant 32 : index
    %c0_19 = arith.constant 0 : index
    %17 = vector.load %arg12[%c32, %c0_19] : memref<72x288xf32, #tpu.memory_space<vmem>>, vector<8x288xf32>
    tpu.vector_store %arg12[%c32, %c0_19], %16 {strides = array<i32>} : memref<72x288xf32, #tpu.memory_space<vmem>>, vector<8x288xf32>,
    %c0_20 = arith.constant 0 : index
    %c0_21 = arith.constant 0 : index
    %c20 = arith.constant 20 : index
    %18 = vector.load %arg1[%c0_20, %c0_21, %c20] : memref<1x8x342xf32, #tpu.memory_space<vmem>>, vector<1x8x288xf32>
    %19 = vector.shape_cast %18 : vector<1x8x288xf32> to vector<8x288xf32>
    %c40 = arith.constant 40 : index
    %c0_22 = arith.constant 0 : index
    %20 = vector.load %arg12[%c40, %c0_22] : memref<72x288xf32, #tpu.memory_space<vmem>>, vector<8x288xf32>
    tpu.vector_store %arg12[%c40, %c0_22], %19 {strides = array<i32>} : memref<72x288xf32, #tpu.memory_space<vmem>>, vector<8x288xf32>,
    %c0_23 = arith.constant 0 : index
    %c0_24 = arith.constant 0 : index
    %c36 = arith.constant 36 : index
    %21 = vector.load %arg1[%c0_23, %c0_24, %c36] : memref<1x8x342xf32, #tpu.memory_space<vmem>>, vector<1x8x288xf32>
    %22 = vector.shape_cast %21 : vector<1x8x288xf32> to vector<8x288xf32>
    %c48 = arith.constant 48 : index
    %c0_25 = arith.constant 0 : index
    %23 = vector.load %arg12[%c48, %c0_25] : memref<72x288xf32, #tpu.memory_space<vmem>>, vector<8x288xf32>
    tpu.vector_store %arg12[%c48, %c0_25], %22 {strides = array<i32>} : memref<72x288xf32, #tpu.memory_space<vmem>>, vector<8x288xf32>,
    %c0_26 = arith.constant 0 : index
    %c0_27 = arith.constant 0 : index
    %c37 = arith.constant 37 : index
    %24 = vector.load %arg1[%c0_26, %c0_27, %c37] : memref<1x8x342xf32, #tpu.memory_space<vmem>>, vector<1x8x288xf32>
    %25 = vector.shape_cast %24 : vector<1x8x288xf32> to vector<8x288xf32>
    %c56 = arith.constant 56 : index
    %c0_28 = arith.constant 0 : index
    %26 = vector.load %arg12[%c56, %c0_28] : memref<72x288xf32, #tpu.memory_space<vmem>>, vector<8x288xf32>
    tpu.vector_store %arg12[%c56, %c0_28], %25 {strides = array<i32>} : memref<72x288xf32, #tpu.memory_space<vmem>>, vector<8x288xf32>,
    %c0_29 = arith.constant 0 : index
    %c0_30 = arith.constant 0 : index
    %c38 = arith.constant 38 : index
    %27 = vector.load %arg1[%c0_29, %c0_30, %c38] : memref<1x8x342xf32, #tpu.memory_space<vmem>>, vector<1x8x288xf32>
    %28 = vector.shape_cast %27 : vector<1x8x288xf32> to vector<8x288xf32>
    %c64 = arith.constant 64 : index
    %c0_31 = arith.constant 0 : index
    %29 = vector.load %arg12[%c64, %c0_31] : memref<72x288xf32, #tpu.memory_space<vmem>>, vector<8x288xf32>
    tpu.vector_store %arg12[%c64, %c0_31], %28 {strides = array<i32>} : memref<72x288xf32, #tpu.memory_space<vmem>>, vector<8x288xf32>,
    %c0_32 = arith.constant 0 : index
    %c0_33 = arith.constant 0 : index
    %30 = vector.load %arg12[%c0_32, %c0_33] : memref<72x288xf32, #tpu.memory_space<vmem>>, vector<72x288xf32>
    %c0_34 = arith.constant 0 : index
    %c0_35 = arith.constant 0 : index
    %31 = vector.load %arg8[%c0_34, %c0_35] : memref<8x72xf32, #tpu.memory_space<vmem>>, vector<8x72xf32>
    %cst = arith.constant dense<0.000000e+00> : vector<8x288xf32>
    %32 = tpu.matmul %31, %30, %cst {dimension_numbers = #tpu.dot_dimension_numbers<[1], [0], [0], [1], [0, 0, 1, 1], [], []>} : vector<8x72xf32>, vector<72x288xf32>, vector<8x288xf32> -> vector<8x288xf32>
    %c0_36 = arith.constant 0 : index
    %c0_37 = arith.constant 0 : index
    %33 = vector.load %arg9[%c0_36, %c0_37] : memref<8x1xf32, #tpu.memory_space<vmem>>, vector<8x1xf32>
    %34 = vector.broadcast %33 : vector<8x1xf32> to vector<8x288xf32>
    %35 = arith.addf %32, %34 : vector<8x288xf32>
    %cst_38 = arith.constant 0.000000e+00 : f32
    %36 = vector.broadcast %cst_38 : f32 to vector<72x288xf32>
    %37 = arith.cmpf ogt, %30, %36 : vector<72x288xf32>
    %38 = vector.broadcast %0 : f32 to vector<72x288xf32>
    %39 = arith.mulf %38, %30 : vector<72x288xf32>
    %40 = arith.select %37, %30, %39 : vector<72x288xi1>, vector<72x288xf32>
    %c0_39 = arith.constant 0 : index
    %c0_40 = arith.constant 0 : index
    %41 = vector.load %arg4[%c0_39, %c0_40] : memref<8x72xf32, #tpu.memory_space<vmem>>, vector<8x72xf32>
    %cst_41 = arith.constant dense<0.000000e+00> : vector<8x288xf32>
    %42 = tpu.matmul %41, %40, %cst_41 {dimension_numbers = #tpu.dot_dimension_numbers<[1], [0], [0], [1], [0, 0, 1, 1], [], []>} : vector<8x72xf32>, vector<72x288xf32>, vector<8x288xf32> -> vector<8x288xf32>
    %c0_42 = arith.constant 0 : index
    %c0_43 = arith.constant 0 : index
    %43 = vector.load %arg5[%c0_42, %c0_43] : memref<8x1xf32, #tpu.memory_space<vmem>>, vector<8x1xf32>
    %44 = vector.broadcast %43 : vector<8x1xf32> to vector<8x288xf32>
    %45 = arith.addf %42, %44 : vector<8x288xf32>
    %cst_44 = arith.constant 0.000000e+00 : f32
    %46 = vector.broadcast %cst_44 : f32 to vector<8x288xf32>
    %47 = arith.cmpf ogt, %45, %46 : vector<8x288xf32>
    %48 = vector.broadcast %1 : f32 to vector<8x288xf32>
    %49 = arith.mulf %48, %45 : vector<8x288xf32>
    %50 = arith.select %47, %45, %49 : vector<8x288xi1>, vector<8x288xf32>
    %51 = vector.broadcast %2 : vector<1x288xf32> to vector<8x288xf32>
    %52 = arith.mulf %50, %51 : vector<8x288xf32>
    %cst_45 = arith.constant 0.000000e+00 : f32
    %53 = vector.broadcast %cst_45 : f32 to vector<8x19xf32>
    %c0_46 = arith.constant 0 : index
    %c0_47 = arith.constant 0 : index
    %54 = vector.load %arg11[%c0_46, %c0_47] : memref<8x342xf32, #tpu.memory_space<vmem>>, vector<8x19xf32>
    tpu.vector_store %arg11[%c0_46, %c0_47], %53 {strides = array<i32>} : memref<8x342xf32, #tpu.memory_space<vmem>>, vector<8x19xf32>,
    %cst_48 = arith.constant 0.000000e+00 : f32
    %55 = vector.broadcast %cst_48 : f32 to vector<8x35xf32>
    %c0_49 = arith.constant 0 : index
    %c307 = arith.constant 307 : index
    %56 = vector.load %arg11[%c0_49, %c307] : memref<8x342xf32, #tpu.memory_space<vmem>>, vector<8x35xf32>
    tpu.vector_store %arg11[%c0_49, %c307], %55 {strides = array<i32>} : memref<8x342xf32, #tpu.memory_space<vmem>>, vector<8x35xf32>,
    %c0_50 = arith.constant 0 : index
    %c19_51 = arith.constant 19 : index
    %57 = vector.load %arg11[%c0_50, %c19_51] : memref<8x342xf32, #tpu.memory_space<vmem>>, vector<8x288xf32>
    tpu.vector_store %arg11[%c0_50, %c19_51], %52 {strides = array<i32>} : memref<8x342xf32, #tpu.memory_space<vmem>>, vector<8x288xf32>,
    %c0_52 = arith.constant 0 : index
    %c0_53 = arith.constant 0 : index
    %58 = vector.load %arg11[%c0_52, %c0_53] : memref<8x342xf32, #tpu.memory_space<vmem>>, vector<8x288xf32>
    %c0_54 = arith.constant 0 : index
    %c0_55 = arith.constant 0 : index
    %59 = vector.load %arg12[%c0_54, %c0_55] : memref<72x288xf32, #tpu.memory_space<vmem>>, vector<8x288xf32>
    tpu.vector_store %arg12[%c0_54, %c0_55], %58 {strides = array<i32>} : memref<72x288xf32, #tpu.memory_space<vmem>>, vector<8x288xf32>,
    %c0_56 = arith.constant 0 : index
    %c1_57 = arith.constant 1 : index
    %60 = vector.load %arg11[%c0_56, %c1_57] : memref<8x342xf32, #tpu.memory_space<vmem>>, vector<8x288xf32>
    %c8_58 = arith.constant 8 : index
    %c0_59 = arith.constant 0 : index
    %61 = vector.load %arg12[%c8_58, %c0_59] : memref<72x288xf32, #tpu.memory_space<vmem>>, vector<8x288xf32>
    tpu.vector_store %arg12[%c8_58, %c0_59], %60 {strides = array<i32>} : memref<72x288xf32, #tpu.memory_space<vmem>>, vector<8x288xf32>,
    %c0_60 = arith.constant 0 : index
    %c2_61 = arith.constant 2 : index
    %62 = vector.load %arg11[%c0_60, %c2_61] : memref<8x342xf32, #tpu.memory_space<vmem>>, vector<8x288xf32>
    %c16_62 = arith.constant 16 : index
    %c0_63 = arith.constant 0 : index
    %63 = vector.load %arg12[%c16_62, %c0_63] : memref<72x288xf32, #tpu.memory_space<vmem>>, vector<8x288xf32>
    tpu.vector_store %arg12[%c16_62, %c0_63], %62 {strides = array<i32>} : memref<72x288xf32, #tpu.memory_space<vmem>>, vector<8x288xf32>,
    %c0_64 = arith.constant 0 : index
    %c18_65 = arith.constant 18 : index
    %64 = vector.load %arg11[%c0_64, %c18_65] : memref<8x342xf32, #tpu.memory_space<vmem>>, vector<8x288xf32>
    %c24_66 = arith.constant 24 : index
    %c0_67 = arith.constant 0 : index
    %65 = vector.load %arg12[%c24_66, %c0_67] : memref<72x288xf32, #tpu.memory_space<vmem>>, vector<8x288xf32>
    tpu.vector_store %arg12[%c24_66, %c0_67], %64 {strides = array<i32>} : memref<72x288xf32, #tpu.memory_space<vmem>>, vector<8x288xf32>,
    %c0_68 = arith.constant 0 : index
    %c19_69 = arith.constant 19 : index
    %66 = vector.load %arg11[%c0_68, %c19_69] : memref<8x342xf32, #tpu.memory_space<vmem>>, vector<8x288xf32>
    %c32_70 = arith.constant 32 : index
    %c0_71 = arith.constant 0 : index
    %67 = vector.load %arg12[%c32_70, %c0_71] : memref<72x288xf32, #tpu.memory_space<vmem>>, vector<8x288xf32>
    tpu.vector_store %arg12[%c32_70, %c0_71], %66 {strides = array<i32>} : memref<72x288xf32, #tpu.memory_space<vmem>>, vector<8x288xf32>,
    %c0_72 = arith.constant 0 : index
    %c20_73 = arith.constant 20 : index
    %68 = vector.load %arg11[%c0_72, %c20_73] : memref<8x342xf32, #tpu.memory_space<vmem>>, vector<8x288xf32>
    %c40_74 = arith.constant 40 : index
    %c0_75 = arith.constant 0 : index
    %69 = vector.load %arg12[%c40_74, %c0_75] : memref<72x288xf32, #tpu.memory_space<vmem>>, vector<8x288xf32>
    tpu.vector_store %arg12[%c40_74, %c0_75], %68 {strides = array<i32>} : memref<72x288xf32, #tpu.memory_space<vmem>>, vector<8x288xf32>,
    %c0_76 = arith.constant 0 : index
    %c36_77 = arith.constant 36 : index
    %70 = vector.load %arg11[%c0_76, %c36_77] : memref<8x342xf32, #tpu.memory_space<vmem>>, vector<8x288xf32>
    %c48_78 = arith.constant 48 : index
    %c0_79 = arith.constant 0 : index
    %71 = vector.load %arg12[%c48_78, %c0_79] : memref<72x288xf32, #tpu.memory_space<vmem>>, vector<8x288xf32>
    tpu.vector_store %arg12[%c48_78, %c0_79], %70 {strides = array<i32>} : memref<72x288xf32, #tpu.memory_space<vmem>>, vector<8x288xf32>,
    %c0_80 = arith.constant 0 : index
    %c37_81 = arith.constant 37 : index
    %72 = vector.load %arg11[%c0_80, %c37_81] : memref<8x342xf32, #tpu.memory_space<vmem>>, vector<8x288xf32>
    %c56_82 = arith.constant 56 : index
    %c0_83 = arith.constant 0 : index
    %73 = vector.load %arg12[%c56_82, %c0_83] : memref<72x288xf32, #tpu.memory_space<vmem>>, vector<8x288xf32>
    tpu.vector_store %arg12[%c56_82, %c0_83], %72 {strides = array<i32>} : memref<72x288xf32, #tpu.memory_space<vmem>>, vector<8x288xf32>,
    %c0_84 = arith.constant 0 : index
    %c38_85 = arith.constant 38 : index
    %74 = vector.load %arg11[%c0_84, %c38_85] : memref<8x342xf32, #tpu.memory_space<vmem>>, vector<8x288xf32>
    %c64_86 = arith.constant 64 : index
    %c0_87 = arith.constant 0 : index
    %75 = vector.load %arg12[%c64_86, %c0_87] : memref<72x288xf32, #tpu.memory_space<vmem>>, vector<8x288xf32>
    tpu.vector_store %arg12[%c64_86, %c0_87], %74 {strides = array<i32>} : memref<72x288xf32, #tpu.memory_space<vmem>>, vector<8x288xf32>,
    %c0_88 = arith.constant 0 : index
    %c0_89 = arith.constant 0 : index
    %76 = vector.load %arg6[%c0_88, %c0_89] : memref<8x72xf32, #tpu.memory_space<vmem>>, vector<8x72xf32>
    %c0_90 = arith.constant 0 : index
    %c0_91 = arith.constant 0 : index
    %77 = vector.load %arg12[%c0_90, %c0_91] : memref<72x288xf32, #tpu.memory_space<vmem>>, vector<72x288xf32>
    %cst_92 = arith.constant dense<0.000000e+00> : vector<8x288xf32>
    %78 = tpu.matmul %76, %77, %cst_92 {dimension_numbers = #tpu.dot_dimension_numbers<[1], [0], [0], [1], [0, 0, 1, 1], [], []>} : vector<8x72xf32>, vector<72x288xf32>, vector<8x288xf32> -> vector<8x288xf32>
    %c0_93 = arith.constant 0 : index
    %c0_94 = arith.constant 0 : index
    %79 = vector.load %arg7[%c0_93, %c0_94] : memref<8x1xf32, #tpu.memory_space<vmem>>, vector<8x1xf32>
    %80 = vector.broadcast %79 : vector<8x1xf32> to vector<8x288xf32>
    %81 = arith.addf %78, %80 : vector<8x288xf32>
    %82 = arith.addf %81, %35 : vector<8x288xf32>
    %c0_95 = arith.constant 0 : index
    %c0_96 = arith.constant 0 : index
    %c0_97 = arith.constant 0 : index
    %83 = vector.load %arg10[%c0_95, %c0_96, %c0_97] : memref<1x8x288xf32, #tpu.memory_space<vmem>>, vector<1x8x288xf32>
    %84 = vector.shape_cast %83 : vector<1x8x288xf32> to vector<8x288xf32>
    %85 = vector.shape_cast %82 : vector<8x288xf32> to vector<1x8x288xf32>
    tpu.vector_store %arg10[%c0_95, %c0_96, %c0_97], %85 {strides = array<i32>} : memref<1x8x288xf32, #tpu.memory_space<vmem>>, vector<1x8x288xf32>,
    return
  }
  func.func @transform_0(%arg0: i32) -> (i32, i32, i32) {
    %c0_i32 = arith.constant 0 : i32
    %c0_i32_0 = arith.constant 0 : i32
    %c0_i32_1 = arith.constant 0 : i32
    return %arg0, %c0_i32, %c0_i32_0 : i32, i32, i32
  }
  func.func @transform_1(%arg0: i32) -> i32 {
    %c0_i32 = arith.constant 0 : i32
    %c0_i32_0 = arith.constant 0 : i32
    return %c0_i32 : i32
  }
  func.func @transform_2(%arg0: i32) -> (i32, i32) {
    %c0_i32 = arith.constant 0 : i32
    %c0_i32_0 = arith.constant 0 : i32
    %c0_i32_1 = arith.constant 0 : i32
    return %c0_i32, %c0_i32_0 : i32, i32
  }
  func.func @transform_3(%arg0: i32) -> (i32, i32) {
    %c0_i32 = arith.constant 0 : i32
    %c0_i32_0 = arith.constant 0 : i32
    %c0_i32_1 = arith.constant 0 : i32
    return %c0_i32, %c0_i32_0 : i32, i32
  }
  func.func @transform_4(%arg0: i32) -> (i32, i32) {
    %c0_i32 = arith.constant 0 : i32
    %c0_i32_0 = arith.constant 0 : i32
    %c0_i32_1 = arith.constant 0 : i32
    return %c0_i32, %c0_i32_0 : i32, i32
  }
  func.func @transform_5(%arg0: i32) -> (i32, i32) {
    %c0_i32 = arith.constant 0 : i32
    %c0_i32_0 = arith.constant 0 : i32
    %c0_i32_1 = arith.constant 0 : i32
    return %c0_i32, %c0_i32_0 : i32, i32
  }
  func.func @transform_6(%arg0: i32) -> (i32, i32) {
    %c0_i32 = arith.constant 0 : i32
    %c0_i32_0 = arith.constant 0 : i32
    %c0_i32_1 = arith.constant 0 : i32
    return %c0_i32, %c0_i32_0 : i32, i32
  }
  func.func @transform_7(%arg0: i32) -> (i32, i32) {
    %c0_i32 = arith.constant 0 : i32
    %c0_i32_0 = arith.constant 0 : i32
    %c0_i32_1 = arith.constant 0 : i32
    return %c0_i32, %c0_i32_0 : i32, i32
  }
  func.func @transform_8(%arg0: i32) -> (i32, i32) {
    %c0_i32 = arith.constant 0 : i32
    %c0_i32_0 = arith.constant 0 : i32
    %c0_i32_1 = arith.constant 0 : i32
    return %c0_i32, %c0_i32_0 : i32, i32
  }
  func.func @transform_9(%arg0: i32) -> (i32, i32, i32) {
    %c0_i32 = arith.constant 0 : i32
    %c0_i32_0 = arith.constant 0 : i32
    %c0_i32_1 = arith.constant 0 : i32
    return %arg0, %c0_i32, %c0_i32_0 : i32, i32, i32
  }
}

</mosaic_0001>

<bundles_post_ra>
// kernel: tpu_custom_call.1
= control target key start
LH: loop header
LB: loop body
LE: loop exit
PB: predicated region body
PF: predicated region fallthrough
CT: control target
= control target key end

     0   :  { %s2021_s0 = inlined_call_operand.hbm [shape: f32[2,8,342], index: 0, kind: input, shape index: {}]   ;;  %s2022_s1 = inlined_call_operand.vmem [shape: f32[2], index: 1, kind: input, shape index: {}]   ;;  %s2023_s2 = inlined_call_operand.hbm [shape: f32[1,288], index: 2, kind: input, shape index: {}]   ;;  %s2024_s3 = inlined_call_operand.vmem [shape: f32[8,72], index: 3, kind: input, shape index: {}]   ;;  %s2025_s4 = inlined_call_operand.vmem [shape: f32[8,1], index: 4, kind: input, shape index: {}]   ;;  %s2026_s5 = inlined_call_operand.vmem [shape: f32[8,72], index: 5, kind: input, shape index: {}]   ;;  %s2027_s6 = inlined_call_operand.vmem [shape: f32[8,1], index: 6, kind: input, shape index: {}]   ;;  %s2028_s7 = inlined_call_operand.vmem [shape: f32[8,72], index: 7, kind: input, shape index: {}]   ;;  %s2029_s8 = inlined_call_operand.vmem [shape: f32[8,1], index: 8, kind: input, shape index: {}]   ;;  %s2030_s9 = inlined_call_operand.hbm [shape: f32[2,8,288], index: 9, kind: output, shape index: {}]  }
   0x1   :  { %2034 = sst [smem:[#allocation19_spill]] %s2022_s1 }
   0x2   :  { %2035 = sst [smem:[#allocation20_spill]] %s2023_s2 }
   0x3   :  { %14 = vsyncpa [#allocation5], 0 }
   0x4   :  { %16 = vsyncpa [#allocation5 + $0x1], 0 }
   0x5   :  { %17 = vsyncpa [#allocation7], 0 }
   0x6   :  { %18 = vsyncpa [#allocation10], 0 }
   0x7   :  { %19 = vsyncpa [#allocation6], 0 }
   0x8   :  { %21 = vsyncpa [#allocation6 + $0x1], 0  ;;  %s1549_s30 = smov 0   ;;  %s1551_s10 = smov 0  }
   0x9   :  { %s1553_s11 = smov 0   ;;  %s1555_s12 = smov 0  }
   0xa LB: > { %2036 = sst [smem:[#allocation16_spill]] %s1480_s11  ;;  %s1570_s13 = sadd.s32 4294967295, %s1484_s12   ;;  %s1484_s12 = sphi %s1555_s12, %s2047_s12   ;;  %s1480_s11 = sphi %s1553_s11, %s2049_s11   ;;  %s1476_s10 = sphi %s1551_s10, %s2051_s10   ;;  %s1472_s30 = sphi %s1549_s30, %s2050_s30  }
   0xb   : > { %s1229_s14 = sadd.s32 4294967294, %s1484_s12   ;;  %p47_p0 = scmp.ne.s32.totalorder %s1476_s10, %s1472_s30 }
   0xc   : > { %p48_p1 = scmp.eq.s32.totalorder %s1570_s13, 0  ;;  %p239_p2 = scmp.eq.s32.totalorder %s1570_s13, 1 }
   0xd   : > { %p245_p3 = scmp.eq.s32.totalorder %s1229_s14, 1  ;;  %p1230_p5 = scmp.ge.s32.totalorder %s1484_s12, 1 }
   0xe   : > { %p1579_p4 = por %p48_p1, %p47_p0  ;;  %p252_p7 = scmp.lt.s32.totalorder %s1484_s12, 3 }
   0xf   : > { %p1584_p6 = por %p245_p3, %p47_p0  ;;  %s2039_s1 = sld [smem:[#allocation19_spill]] }
  0x10   : > { %p1592_p8 = pnand %p1230_p5, %p252_p7  ;;  %s2041_s2 = sld [smem:[#allocation20_spill]] }
  0x11   : > { %s1486_s24 = smov [#allocation9]   ;;  %s1487_s26 = smov [#allocation8]  }
  0x12   : > { %p1267_p10 = pneg %p1592_p8  ;;  %s276_s25 = sshll.u32 %s1486_s24, 4  ;;  %s277_s25 = int_to_ptr.vmem [resolvable:$true] %s276_s25 }
  0x13   : > { %s1605_s27 = sadd.s32 1, %s1484_s12   ;;  %s34_s28 = sadd.s32 1, %s1480_s11 }
  0x14   : > { %p1268_p11 = pnand %p1267_p10, %p48_p1  ;;  %2042 = sst [smem:[#allocation17_spill]] %s1605_s27 }
  0x15   : > { %s264_s19 = sshll.u32 %s2039_s1, 4  ;;  %s31_s29 = ssub.s32 %s1484_s12, %s1605_s27  ;;  %s265_s19 = int_to_ptr.vmem [resolvable:$true] %s264_s19 }
  0x16   : > { %s274_s23 = sshll.u32 %s2041_s2, 4  ;;  %p41_p12 = scmp.ne.s32.totalorder %s1480_s11, %s1476_s10  ;;  %s275_s23 = int_to_ptr.hbm [resolvable:$true] %s274_s23 }
  0x17   : > { %1270 = dma.vmem_to_smem (!%p1268_p11), %s265_s19, 16, %s1487_s26, [#allocation7]  }
  0x18   : > { %1273 = dma.hbm_to_vmem [thread:$0]  (!%p1268_p11), %s275_s23, 48, %s277_s25, [#allocation10]  }
  0x19   : > { %p32_p13 = scmp.eq.s32.totalorder %s31_s29, 0  ;;  %p42_p0 = scmp.eq.s32.totalorder %s1484_s12, 0 }
  0x1a   : > { %p1615_p3 = por %p239_p2, %p41_p12  ;;  %p1284_p5 = scmp.lt.s32.totalorder %s1484_s12, 2 }
  0x1b   : > { %s1621_s17 = scalar_select %p32_p13, %s1480_s11, %s34_s28  }
  0x1c   : > { %p43_p7 = por %p42_p0, %p41_p12  ;;  %s305_s18 = sand.u32 1, %s1480_s11  }
  0x1d   : > { %2044 = sst [smem:[#allocation18_spill]] %s1621_s17  ;;  %s1251_s19 = smul.u32 24, %s305_s18 }
  0x1e   : > { %s1252_s21 = smul.u32 24, %s1484_s12  ;;  %p1625_p10 = pnand %p1284_p5, %p43_p7 }
  0x1f   : > { %s309_s26 = scalar_lea.vmem [#allocation4], %s1251_s19  ;;  %s306_s28 = scalar_lea.sflag [#allocation5], %s305_s18 }
  0x20   : > { %s314_s25 = scalar_lea.hbm %s2021_s0, %s1252_s21  ;;  %s318_s29 = sshll.u32 %s309_s26, 4  ;;  %s319_s29 = int_to_ptr.vmem [resolvable:$true] %s318_s29 }
  0x21   : > { %s316_s1 = sshll.u32 %s314_s25, 4  ;;  %p1384_p11 = pneg %p1625_p10  ;;  %s317_s1 = int_to_ptr.hbm [resolvable:$true] %s316_s1 }
  0x22   : > { %s1380_s2 = sshra.s32 %s317_s1, 4  ;;  %s1387_s23 = scalar_lea.hbm %s2021_s0, 48  ;;  %s1381_s2 = int_to_ptr.hbm [resolvable:$true] %s1380_s2 }
  0x23   : > { %s1382_s17 = scalar_lea.hbm %s1381_s2, 24  ;;  %p1388_p0 = scmp.lt.s32.totalorder %s1381_s2, %s2021_s0 }
  0x24   : > { %p1383_p2 = scmp.ne.s32.totalorder %s1381_s2, %s1382_s17  ;;  %p1389_p5 = scmp.lt.s32.totalorder %s1387_s23, %s1382_s17 }
  0x26   : > { %p1385_p12 = pnand %p1384_p11, %p1383_p2  ;;  %p1390_p7 = por %p1389_p5, %p1388_p0 }
  0x28   : > { %p1386_p13 = pneg %p1385_p12 }
  0x2a   : > { %p1391_p9 = pnand %p1390_p7, %p1386_p13 }
  0x2c   : > { %1394 = shalt.err (!%p1391_p9)
}
  0x2d   : > { %1277 = dma.hbm_to_vmem [thread:$0]  (!%p1625_p10), %s317_s1, 384, %s319_s29, %s306_s28  }
  0x2e   : > { %327 = sbr.rel (%p1592_p8) target bundleno = 825 (0x339), region = 56  ;;  %s1645_s18 = sand.u32 (!%p1592_p8), 1, %s1476_s10  }
  0x2f   : > { %s1253_s11 = smul.u32 (!%p1592_p8), 24, %s1645_s18  ;;  %s330_s27 = scalar_lea.sflag (!%p1592_p8), [#allocation5], %s1645_s18 }
  0x31   : > { %s333_s2 = scalar_lea.vmem (!%p1592_p8), [#allocation4], %s1253_s11 }
  0x33   : > { %1455 = dma.done.wait (%p1579_p4), %s330_s27, 384  }
  0x34   : > { %1457 = vsyncadd (%p1579_p4), %s330_s27, 4294966912 }
  0x35   : > { %1459 = dma.done.wait (%p48_p1), [#allocation7], 16  }
  0x36   : > { %1461 = vsyncadd (%p48_p1), [#allocation7], 4294967280 }
  0x37   : > { %1463 = dma.done.wait (%p48_p1), [#allocation10], 48  }
  0x38   : > { %1465 = vsyncadd (%p48_p1), [#allocation10], 4294967248 }
  0x39   : > { %349 = sfence }
  0x3a   : > { %v539_v0 = vld [vmem:[%s333_s2 + $0x10] sm:$0xff]  ;;  %v1663_v1 = vld [vmem:[%s333_s2] sm:$0xff]  ;;  %s1488_s1 = smov 90   ;;  %v1668_v2 = vld [vmem:[%s333_s2 + $0x8] sm:$0xff]  ;;  %s1489_s15 = smov 91   ;;  %vm388_vm0 = vcmask 261120  }
  0x3b   : > { %547 = vrot.lane.b32.xlu1 %v539_v0, %s1488_s1  ;;  %543 = vrot.lane.b32.xlu0 %v1663_v1, %s1488_s1  ;;  %s1490_s20 = smov 92   ;;  %s1491_s17 = smov 108   ;;  %389 = vst.msk [vmem:[#allocation3 + $0x10] sm:$0xff] %vm388_vm0, %v539_v0  ;;  %vm549_vm1 = vcmask 736256   ;;  %vm528_vm2 = vcmask 744448   ;;  %vm507_vm5 = vcmask 752640  }
  0x3c   : > { %524 = vrot.lane.b32.xlu2 %v1668_v2, %s1489_s15  ;;  %s1492_s19 = smov 109   ;;  %s1493_s22 = smov 110   ;;  %vm486_vm7 = vcmask 883712   ;;  %vm465_vm9 = vcmask 891904   ;;  %vm444_vm11 = vcmask 900096   ;;  %v1783_v57 = vld [vmem:[%s2028_s7] sm:$0xff] }
  0x3d   : > { %s1494_s25 = smov 126   ;;  %s1495_s26 = smov 127   ;;  %vm592_vm13 = vcmask 588800   ;;  %vm423_vm14 = vcmask 1031168   ;;  %v739_v58 = vld [vmem:[%s2025_s4] sm:$0xff]  ;;  %v1496_v61 = vmov 0  }
  0x3e   : > { %s380_s29 = sld [smem:[#allocation8]]  ;;  %1333 = vset.pattern.permute.xlu0 %v1496_v61  ;;  %1334 = vset.pattern.permute.xlu2 %v1496_v61  ;;  %s1497_s28 = smov 19  }
  0x3f   : > { %s1121_s2 = scalar_lea.sflag [#allocation6], %s1645_s18 }
  0x42   : > { %v1778_v56 = vld [vmem:[#allocation3 + $0x10] sm:$0xff] }
  0x43   : > { %545 = vrot.lane.b32.xlu0 %v1668_v2, %s1488_s1  ;;  %522 = vrot.lane.b32.xlu1 %v1663_v1, %s1489_s15 }
  0x44   : > { %526 = vrot.lane.b32.xlu2 %v539_v0, %s1489_s15  ;;  %v1720_v15 = vstv %s380_s29  ;;  %s1238_s29 = sld [smem:[#allocation8 + $0x1]] }
  0x4b   : > { %503 = vrot.lane.b32.xlu1 %v1668_v2, %s1490_s20  ;;  %501 = vrot.lane.b32.xlu0 %v1663_v1, %s1490_s20 }
  0x4c   : > { %505 = vrot.lane.b32.xlu2 %v539_v0, %s1490_s20 }
  0x53   : > { %482 = vrot.lane.b32.xlu1 %v1668_v2, %s1491_s17  ;;  %480 = vrot.lane.b32.xlu0 %v1663_v1, %s1491_s17 }
  0x54   : > { %484 = vrot.lane.b32.xlu2 %v539_v0, %s1491_s17 }
  0x5b   : > { %461 = vrot.lane.b32.xlu1 %v1668_v2, %s1492_s19  ;;  %459 = vrot.lane.b32.xlu0 %v1663_v1, %s1492_s19 }
  0x5c   : > { %463 = vrot.lane.b32.xlu2 %v539_v0, %s1492_s19 }
  0x63   : > { %440 = vrot.lane.b32.xlu1 %v1668_v2, %s1493_s22  ;;  %438 = vrot.lane.b32.xlu0 %v1663_v1, %s1493_s22 }
  0x64   : > { %442 = vrot.lane.b32.xlu2 %v539_v0, %s1493_s22 }
  0x6b   : > { %419 = vrot.lane.b32.xlu1 %v1668_v2, %s1494_s25  ;;  %417 = vrot.lane.b32.xlu0 %v1663_v1, %s1494_s25 }
  0x6c   : > { %421 = vrot.lane.b32.xlu2 %v539_v0, %s1494_s25 }
  0x73   : > { %398 = vrot.lane.b32.xlu1 %v1668_v2, %s1495_s26  ;;  %396 = vrot.lane.b32.xlu0 %v1663_v1, %s1495_s26 }
  0x74   : > { %400 = vrot.lane.b32.xlu2 %v539_v0, %s1495_s26 }
  0x7b   : > { %742 = vperm.xlu0 %1333, %v739_v58  }
  0x96   : > { %v525_v3 = vpop.permute.xlu2 %524 }
  0x9e   : > { %v527_v4 = vpop.permute.xlu2 %526 }
  0x9f   : > { %536 = vst.msk [vmem:[#allocation3 + $0xb8] sm:$0xff] %vm388_vm0, %v527_v4  ;;  %v1729_v20 = vsel %vm528_vm2, %v525_v3, %v527_v4 }
  0xa6   : > { %v506_v5 = vpop.permute.xlu2 %505  ;;  %v1722_v17 = vld [vmem:[#allocation3 + $0xb8] sm:$0xff] }
  0xa7   : > { %515 = vst.msk [vmem:[#allocation3 + $0xa0] sm:$0xff] %vm388_vm0, %v506_v5 }
  0xad   : > { %v548_v6 = vpop.permute.xlu1 %547  ;;  %v544_v7 = vpop.permute.xlu0 %543 }
  0xae   : > { %557 = vst.msk [vmem:[#allocation3 + $0xd0] sm:$0xff] %vm388_vm0, %v548_v6  ;;  %v485_v8 = vpop.permute.xlu2 %484  ;;  %v1733_v22 = vld [vmem:[#allocation3 + $0xa0] sm:$0xff] }
  0xaf   : > { %494 = vst.msk [vmem:[#allocation3 + $0x88] sm:$0xff] %vm388_vm0, %v485_v8 }
  0xb5   : > { %v546_v9 = vpop.permute.xlu0 %545  ;;  %v523_v10 = vpop.permute.xlu1 %522  ;;  %v1712_v11 = vld [vmem:[#allocation3 + $0xd0] sm:$0xff] }
  0xb6   : > { %v550_v12 = vsel %vm549_vm1, %v544_v7, %v546_v9  ;;  %v1716_v13 = vsel %vm549_vm1, %v546_v9, %v548_v6  ;;  %v529_v14 = vsel %vm528_vm2, %v523_v10, %v525_v3  ;;  %643 = vmatpush.msra.mxu2 %v1712_v11  ;;  %v464_v16 = vpop.permute.xlu2 %463  ;;  %v1736_v24 = vld [vmem:[#allocation3 + $0x88] sm:$0xff]  ;;  %v684_v7 = vmul.f32 %v1720_v15, %v1663_v1 }
  0xb7   : > { %603 = vmatpush.msra.mxu0 %v550_v12  ;;  %623 = vmatpush.msra.mxu1 %v1716_v13  ;;  %vm680_vm3 = vcmp.gt.f32.partialorder %v550_v12, 0.0  ;;  %v708_v18 = vmul.f32 %v1720_v15, %v550_v12  ;;  %v705_v19 = vmul.f32 %v1720_v15, %v529_v14  ;;  %473 = vst.msk [vmem:[#allocation3 + $0x70] sm:$0xff] %vm388_vm0, %v464_v16  ;;  %vm677_vm4 = vcmp.gt.f32.partialorder %v529_v14, 0.0 }
  0xb8   : > { %644 = vmatpush.msra.mxu2 %v1722_v17  ;;  %v709_v4 = vmul.f32 %v1720_v15, %v1716_v13  ;;  %v710_v10 = vmul.f32 %v1720_v15, %v1712_v11 }
  0xb9   : > { %604 = vmatpush.msra.mxu0 %v529_v14  ;;  %624 = vmatpush.msra.mxu1 %v1729_v20  ;;  %v735_v21 = vsel %vm680_vm3, %v550_v12, %v708_v18  ;;  %v732_v23 = vsel %vm677_vm4, %v529_v14, %v705_v19  ;;  %vm402_vm3 = vcmask 1039360   ;;  %vm681_vm4 = vcmp.gt.f32.partialorder %v1716_v13, 0.0 }
  0xba   : > { %755 = vmatpush.msra.mxu3 %v735_v21  ;;  %645 = vmatpush.msra.mxu2 %v1733_v22  ;;  %v706_v14 = vmul.f32 %v1720_v15, %v1729_v20  ;;  %v707_v18 = vmul.f32 %v1720_v15, %v1722_v17 }
  0xbc   : > { %756 = vmatpush.msra.mxu3 %v732_v23  ;;  %646 = vmatpush.msra.mxu2 %v1736_v24 }
  0xbd   : > { %v504_v25 = vpop.permute.xlu1 %503  ;;  %v502_v26 = vpop.permute.xlu0 %501 }
  0xbe   : > { %v1740_v27 = vsel %vm507_vm5, %v504_v25, %v506_v5  ;;  %v508_v28 = vsel %vm507_vm5, %v502_v26, %v504_v25  ;;  %v443_v29 = vpop.permute.xlu2 %442  ;;  %v1746_v31 = vld [vmem:[#allocation3 + $0x70] sm:$0xff]  ;;  %v704_v25 = vmul.f32 %v1720_v15, %v1733_v22  ;;  %v1831_v26 = vld [vmem:[%s2024_s3] sm:$0xff] }
  0xbf   : > { %605 = vmatpush.msra.mxu0 %v508_v28  ;;  %625 = vmatpush.msra.mxu1 %v1740_v27  ;;  %vm674_vm6 = vcmp.gt.f32.partialorder %v508_v28, 0.0  ;;  %v702_v30 = vmul.f32 %v1720_v15, %v508_v28  ;;  %452 = vst.msk [vmem:[#allocation3 + $0x58] sm:$0xff] %vm388_vm0, %v443_v29  ;;  %v703_v21 = vmul.f32 %v1720_v15, %v1740_v27 }
  0xc0   : > { %647 = vmatpush.msra.mxu2 %v1746_v31 }
  0xc1   : > { %v729_v32 = vsel %vm674_vm6, %v508_v28, %v702_v30  ;;  %vm656_vm6 = vcmp.gt.f32.partialorder %v1663_v1, 0.0 }
  0xc2   : > { %757 = vmatpush.msra.mxu3 %v729_v32  ;;  %v711_v23 = vsel %vm656_vm6, %v1663_v1, %v684_v7  ;;  %v698_v32 = vmul.f32 %v1720_v15, %v1746_v31 }
  0xc5   : > { %v483_v33 = vpop.permute.xlu1 %482  ;;  %v481_v34 = vpop.permute.xlu0 %480 }
  0xc6   : > { %v1750_v35 = vsel %vm486_vm7, %v483_v33, %v485_v8  ;;  %v487_v36 = vsel %vm486_vm7, %v481_v34, %v483_v33  ;;  %v422_v37 = vpop.permute.xlu2 %421  ;;  %v1756_v39 = vld [vmem:[#allocation3 + $0x58] sm:$0xff] }
  0xc7   : > { %606 = vmatpush.msra.mxu0 %v487_v36  ;;  %626 = vmatpush.msra.mxu1 %v1750_v35  ;;  %vm671_vm8 = vcmp.gt.f32.partialorder %v487_v36, 0.0  ;;  %v699_v38 = vmul.f32 %v1720_v15, %v487_v36  ;;  %431 = vst.msk [vmem:[#allocation3 + $0x40] sm:$0xff] %vm388_vm0, %v422_v37  ;;  %vm672_vm6 = vcmp.gt.f32.partialorder %v1750_v35, 0.0 }
  0xc8   : > { %648 = vmatpush.msra.mxu2 %v1756_v39 }
  0xc9   : > { %v726_v40 = vsel %vm671_vm8, %v487_v36, %v699_v38 }
  0xca   : > { %758 = vmatpush.msra.mxu3 %v726_v40 }
  0xcd   : > { %v462_v41 = vpop.permute.xlu1 %461  ;;  %v460_v42 = vpop.permute.xlu0 %459 }
  0xce   : > { %v1760_v43 = vsel %vm465_vm9, %v462_v41, %v464_v16  ;;  %v466_v44 = vsel %vm465_vm9, %v460_v42, %v462_v41  ;;  %v401_v45 = vpop.permute.xlu2 %400  ;;  %v1766_v47 = vld [vmem:[#allocation3 + $0x40] sm:$0xff]  ;;  %v736_v16 = vsel %vm681_vm4, %v1716_v13, %v709_v4  ;;  %vm675_vm4 = vcmp.gt.f32.partialorder %v1740_v27, 0.0 }
  0xcf   : > { %607 = vmatpush.msra.mxu0 %v466_v44  ;;  %627 = vmatpush.msra.mxu1 %v1760_v43  ;;  %vm668_vm10 = vcmp.gt.f32.partialorder %v466_v44, 0.0  ;;  %v696_v46 = vmul.f32 %v1720_v15, %v466_v44  ;;  %410 = vst.msk [vmem:[#allocation3 + $0x28] sm:$0xff] %vm388_vm0, %v401_v45  ;;  %v697_v30 = vmul.f32 %v1720_v15, %v1760_v43 }
  0xd0   : > { %649 = vmatpush.msra.mxu2 %v1766_v47  ;;  %v692_v40 = vmul.f32 %v1720_v15, %v1766_v47  ;;  %v685_v42 = vmul.f32 %v1720_v15, %v1668_v2 }
  0xd1   : > { %v723_v48 = vsel %vm668_vm10, %v466_v44, %v696_v46  ;;  %vm682_vm10 = vcmp.gt.f32.partialorder %v1712_v11, 0.0 }
  0xd2   : > { %759 = vmatpush.msra.mxu3 %v723_v48  ;;  %v737_v13 = vsel %vm682_vm10, %v1712_v11, %v710_v10  ;;  %vm673_vm10 = vcmp.gt.f32.partialorder %v1736_v24, 0.0 }
  0xd5   : > { %v441_v49 = vpop.permute.xlu1 %440  ;;  %v439_v50 = vpop.permute.xlu0 %438 }
  0xd6   : > { %v1770_v51 = vsel %vm444_vm11, %v441_v49, %v443_v29  ;;  %v445_v52 = vsel %vm444_vm11, %v439_v50, %v441_v49  ;;  %v1775_v54 = vld [vmem:[#allocation3 + $0x28] sm:$0xff]  ;;  %v701_v29 = vmul.f32 %v1720_v15, %v1736_v24 }
  0xd7   : > { %608 = vmatpush.msra.mxu0 %v445_v52  ;;  %628 = vmatpush.msra.mxu1 %v1770_v51  ;;  %vm665_vm12 = vcmp.gt.f32.partialorder %v445_v52, 0.0  ;;  %v693_v53 = vmul.f32 %v1720_v15, %v445_v52  ;;  %v694_v34 = vmul.f32 %v1720_v15, %v1770_v51 }
  0xd8   : > { %650 = vmatpush.msra.mxu2 %v1775_v54 }
  0xd9   : > { %v720_v55 = vsel %vm665_vm12, %v445_v52, %v693_v53  ;;  %vm678_vm12 = vcmp.gt.f32.partialorder %v1729_v20, 0.0 }
  0xda   : > { %760 = vmatpush.msra.mxu3 %v720_v55  ;;  %651 = vmatpush.msra.mxu2 %v1778_v56  ;;  %v733_v28 = vsel %vm678_vm12, %v1729_v20, %v706_v14  ;;  %v730_v20 = vsel %vm675_vm4, %v1740_v27, %v703_v21  ;;  %vm669_vm12 = vcmp.gt.f32.partialorder %v1760_v43, 0.0  ;;  %v695_v27 = vmul.f32 %v1720_v15, %v1756_v39  ;;  %v1045_v21 = vld [vmem:[%s2027_s6] sm:$0xff] }
  0xdb   : > { %1241 = vmatmul.msk.f32.vlgmr.msra.gmra.mxu2 %vm592_vm13, %v1783_v57  ;;  %vm667_vm4 = vcmp.gt.f32.partialorder %v1756_v39, 0.0  ;;  %v724_v36 = vsel %vm669_vm12, %v1760_v43, %v697_v30  ;;  %v811_v55 = vstv %s1238_s29 }
  0xdc   : > { %v722_v38 = vsel %vm667_vm4, %v1756_v39, %v695_v27  ;;  %v686_v39 = vmul.f32 %v1720_v15, %v1778_v56  ;;  %vm661_vm4 = vcmp.gt.f32.partialorder %v1775_v54, 0.0 }
  0xdd   : > { %v420_v59 = vpop.permute.xlu1 %419  ;;  %v418_v60 = vpop.permute.xlu0 %417 }
  0xde   : > { %v1792_v62 = vsel %vm423_vm14, %v420_v59, %v422_v37  ;;  %v424_v63 = vsel %vm423_vm14, %v418_v60, %v420_v59 }
  0xdf   : > { %609 = vmatpush.msra.mxu0 %v424_v63  ;;  %629 = vmatpush.msra.mxu1 %v1792_v62  ;;  %vm662_vm15 = vcmp.gt.f32.partialorder %v424_v63, 0.0  ;;  %v690_v0 = vmul.f32 %v1720_v15, %v424_v63  ;;  %v691_v37 = vmul.f32 %v1720_v15, %v1792_v62 }
  0xe1   : > { %v717_v3 = vsel %vm662_vm15, %v424_v63, %v690_v0  ;;  %vm679_vm15 = vcmp.gt.f32.partialorder %v1722_v17, 0.0 }
  0xe2   : > { %761 = vmatpush.msra.mxu3 %v717_v3  ;;  %v734_v11 = vsel %vm679_vm15, %v1722_v17, %v707_v18  ;;  %vm670_vm15 = vcmp.gt.f32.partialorder %v1746_v31, 0.0 }
  0xe5   : > { %v399_v5 = vpop.permute.xlu1 %398  ;;  %v397_v6 = vpop.permute.xlu0 %396 }
  0xe6   : > { %v1803_v8 = vsel %vm402_vm3, %v399_v5, %v401_v45  ;;  %v403_v9 = vsel %vm402_vm3, %v397_v6, %v399_v5 }
  0xe7   : > { %610 = vmatpush.msra.mxu0 %v403_v9  ;;  %630 = vmatpush.msra.mxu1 %v1803_v8  ;;  %vm659_vm8 = vcmp.gt.f32.partialorder %v403_v9, 0.0  ;;  %v687_v12 = vmul.f32 %v1720_v15, %v403_v9  ;;  %v688_v41 = vmul.f32 %v1720_v15, %v1803_v8  ;;  %vm660_vm12 = vcmp.gt.f32.partialorder %v1803_v8, 0.0 }
  0xe9   : > { %611 = vmatpush.msra.mxu0 %v1663_v1  ;;  %631 = vmatpush.msra.mxu1 %v1668_v2  ;;  %v714_v19 = vsel %vm659_vm8, %v403_v9, %v687_v12  ;;  %vm676_vm8 = vcmp.gt.f32.partialorder %v1733_v22, 0.0  ;;  %v700_v1 = vmul.f32 %v1720_v15, %v1750_v35  ;;  %v715_v45 = vsel %vm660_vm12, %v1803_v8, %v688_v41 }
  0xea   : > { %762 = vmatpush.msra.mxu3 %v714_v19  ;;  %1239 = vmatmul.msk.f32.vlgmr.msra.gmra.mxu0 %vm592_vm13, %v1783_v57  ;;  %v731_v17 = vsel %vm676_vm8, %v1733_v22, %v704_v25  ;;  %v728_v22 = vsel %vm673_vm10, %v1736_v24, %v701_v29  ;;  %vm666_vm8 = vcmp.gt.f32.partialorder %v1770_v51, 0.0  ;;  %vm664_vm10 = vcmp.gt.f32.partialorder %v1766_v47, 0.0 }
  0xeb   : > { %775 = vmatpush.msrb.mxu0 %v736_v16  ;;  %795 = vmatpush.msrb.mxu1 %v737_v13  ;;  %v727_v33 = vsel %vm672_vm6, %v1750_v35, %v700_v1  ;;  %v725_v35 = vsel %vm670_vm15, %v1746_v31, %v698_v32  ;;  %vm663_vm6 = vcmp.gt.f32.partialorder %v1792_v62, 0.0  ;;  %v721_v24 = vsel %vm666_vm8, %v1770_v51, %v694_v34 }
  0xec   : > { %763 = vmatpush.msra.mxu3 %v711_v23  ;;  %1240 = vmatmul.msk.f32.vlgmr.msra.gmra.mxu1 %vm592_vm13, %v1783_v57  ;;  %v689_v31 = vmul.f32 %v1720_v15, %v1775_v54  ;;  %vm657_vm15 = vcmp.gt.f32.partialorder %v1668_v2, 0.0  ;;  %v718_v43 = vsel %vm663_vm6, %v1792_v62, %v691_v37  ;;  %vm658_vm8 = vcmp.gt.f32.partialorder %v1778_v56, 0.0  ;;  %v586_v23 = vld [vmem:[%s2029_s8] sm:$0xff] }
  0xed   : > { %776 = vmatpush.msrb.mxu0 %v733_v28  ;;  %796 = vmatpush.msrb.mxu1 %v734_v11  ;;  %v719_v44 = vsel %vm664_vm10, %v1766_v47, %v692_v40  ;;  %v712_v46 = vsel %vm657_vm15, %v1668_v2, %v685_v42  ;;  %v713_v15 = vsel %vm658_vm8, %v1778_v56, %v686_v39  ;;  %v743_v2 = vpop.permute.xlu0 %742  ;;  %vm830_vm15 = vcmask 703896  }
  0xee   : > { %1242 = vmatmul.msk.f32.vlgmr.msra.gmra.mxu3 %vm592_vm13, %v1831_v26  ;;  %v716_v48 = vsel %vm661_vm4, %v1775_v54, %v689_v31  ;;  %v382_v54 = vld [vmem:[#allocation9] sm:$0x7]  ;;  %vm828_vm4 = vcmask 154624   ;;  %v1498_v8 = vmov 0.0   ;;  %vm849_vm8 = vcmask 416768  }
  0xef   : > { %777 = vmatpush.msrb.mxu0 %v730_v20  ;;  %797 = vmatpush.msrb.mxu1 %v731_v17  ;;  %v820_v57 = vperm.slane %v382_v54, 1  ;;  %v821_v59 = vperm.slane %v382_v54, 2  ;;  %v819_v5 = vperm.slane %v382_v54, 0  ;;  %831 = vst.msk [vmem:[#allocation2 + $0x10] sm:$0xff] %vm830_vm15, %v1498_v8 }
  0xf0   : > { %829 = vst.msk [vmem:[#allocation2] sm:$0xff] %vm828_vm4, %v1498_v8 }
  0xf1   : > { %778 = vmatpush.msrb.mxu0 %v727_v33  ;;  %798 = vmatpush.msrb.mxu1 %v728_v22 }
  0xf3   : > { %779 = vmatpush.msrb.mxu0 %v724_v36  ;;  %799 = vmatpush.msrb.mxu1 %v725_v35 }
  0xf5   : > { %780 = vmatpush.msrb.mxu0 %v721_v24  ;;  %800 = vmatpush.msrb.mxu1 %v722_v38 }
  0xf7   : > { %781 = vmatpush.msrb.mxu0 %v718_v43  ;;  %801 = vmatpush.msrb.mxu1 %v719_v44 }
  0xf9   : > { %782 = vmatpush.msrb.mxu0 %v715_v45  ;;  %802 = vmatpush.msrb.mxu1 %v716_v48 }
  0xfb   : > { %783 = vmatpush.msrb.mxu0 %v712_v46  ;;  %803 = vmatpush.msrb.mxu1 %v713_v15 }
  0xfc   : > { %1243 = vmatmul.msk.f32.vlgmr.msrb.gmra.mxu0 %vm592_vm13, %v1831_v26  ;;  %1244 = vmatmul.msk.f32.vlgmr.msrb.gmra.mxu1 %vm592_vm13, %v1831_v26 }
 0x167   : > { %v1896_v47 = vpop.f32.mrf.mxu0 }
 0x169   : > { %v1898_v49 = vpop.f32.mrf.mxu1 }
 0x171   : > { %v765_v51 = vpop.f32.mrf.mxu3 }
 0x172   : > { %v766_v60 = vadd.f32 %v765_v51, %v743_v2 }
 0x174   : > { %v812_v4 = vmul.f32 %v811_v55, %v766_v60  ;;  %vm808_vm12 = vcmp.gt.f32.partialorder %v766_v60, 0.0 }
 0x176   : > { %v815_v6 = vsel %vm808_vm12, %v766_v60, %v812_v4 }
 0x177   : > { %v825_v7 = vmul.f32 %v819_v5, %v815_v6  ;;  %v653_v6 = vpop.f32.mrf.mxu2 }
 0x179   : > { %v785_v50 = vpop.f32.mrf.mxu0  ;;  %v805_v53 = vpop.f32.mrf.mxu1 }
 0x17a   : > { %v786_v52 = vadd.f32 %v785_v50, %v743_v2  ;;  %v806_v56 = vadd.f32 %v805_v53, %v743_v2 }
 0x17c   : > { %vm809_vm6 = vcmp.gt.f32.partialorder %v786_v52, 0.0  ;;  %v813_v58 = vmul.f32 %v811_v55, %v786_v52  ;;  %vm810_vm10 = vcmp.gt.f32.partialorder %v806_v56, 0.0  ;;  %v814_v61 = vmul.f32 %v811_v55, %v806_v56 }
 0x17e   : > { %v816_v62 = vsel %vm809_vm6, %v786_v52, %v813_v58  ;;  %v817_v63 = vsel %vm810_vm10, %v806_v56, %v814_v61  ;;  %vm846_vm6 = vcmask 1047704  }
 0x17f   : > { %v826_v0 = vmul.f32 %v820_v57, %v816_v62  ;;  %v827_v3 = vmul.f32 %v821_v59, %v817_v63 }
 0x181   : > { %837 = vrot.lane.b32.xlu2 %v826_v0, %s1497_s28  ;;  %839 = vrot.lane.b32.xlu1 %v827_v3, %s1497_s28  ;;  %v1017_v3 = vld [vmem:[%s2026_s5] sm:$0xff] }
 0x189   : > { %835 = vrot.lane.b32.xlu1 %v825_v7, %s1497_s28 }
 0x1db   : > { %v838_v9 = vpop.permute.xlu2 %837 }
 0x1f3   : > { %v840_v10 = vpop.permute.xlu1 %839 }
 0x1f4   : > { %v842_v12 = vsel %vm828_vm4, %v838_v9, %v840_v10 }
 0x1f5   : > { %850 = vst.msk [vmem:[#allocation2 + $0x10] sm:$0xff] %vm849_vm8, %v842_v12 }
 0x1fb   : > { %v836_v14 = vpop.permute.xlu1 %835 }
 0x1fc   : > { %v853_v16 = vld [vmem:[#allocation2 + $0x10] sm:$0xff]  ;;  %v1900_v18 = vsel %vm828_vm4, %v836_v14, %v838_v9  ;;  %847 = vst.msk [vmem:[#allocation2] sm:$0xff] %vm846_vm6, %v836_v14 }
 0x1fd   : > { %856 = vst.msk [vmem:[#allocation3 + $0x10] sm:$0xff] %vm388_vm0, %v853_v16  ;;  %1007 = vrot.lane.b32.xlu1 %v853_v16, %s1488_s1  ;;  %1005 = vrot.lane.b32.xlu0 %v1900_v18, %s1488_s1 }
 0x203   : > { %v1906_v19 = vld [vmem:[#allocation2] sm:$0xff] }
 0x204   : > { %1003 = vrot.lane.b32.xlu2 %v1906_v19, %s1488_s1  ;;  %v1020_v5 = vld [vmem:[#allocation3 + $0x10] sm:$0xff] }
 0x205   : > { %987 = vrot.lane.b32.xlu1 %v853_v16, %s1489_s15  ;;  %985 = vrot.lane.b32.xlu0 %v1900_v18, %s1489_s15 }
 0x20c   : > { %983 = vrot.lane.b32.xlu2 %v1906_v19, %s1489_s15  ;;  %s1430_s15 = scalar_lea.hbm %s2030_s9, 48 }
 0x20d   : > { %967 = vrot.lane.b32.xlu1 %v853_v16, %s1490_s20  ;;  %965 = vrot.lane.b32.xlu0 %v1900_v18, %s1490_s20 }
 0x214   : > { %963 = vrot.lane.b32.xlu2 %v1906_v19, %s1490_s20 }
 0x215   : > { %947 = vrot.lane.b32.xlu1 %v853_v16, %s1491_s17  ;;  %945 = vrot.lane.b32.xlu0 %v1900_v18, %s1491_s17 }
 0x21c   : > { %943 = vrot.lane.b32.xlu2 %v1906_v19, %s1491_s17 }
 0x21d   : > { %927 = vrot.lane.b32.xlu1 %v853_v16, %s1492_s19  ;;  %925 = vrot.lane.b32.xlu0 %v1900_v18, %s1492_s19 }
 0x224   : > { %923 = vrot.lane.b32.xlu2 %v1906_v19, %s1492_s19 }
 0x225   : > { %907 = vrot.lane.b32.xlu1 %v853_v16, %s1493_s22  ;;  %905 = vrot.lane.b32.xlu0 %v1900_v18, %s1493_s22 }
 0x22c   : > { %903 = vrot.lane.b32.xlu2 %v1906_v19, %s1493_s22 }
 0x22d   : > { %887 = vrot.lane.b32.xlu1 %v853_v16, %s1494_s25  ;;  %885 = vrot.lane.b32.xlu0 %v1900_v18, %s1494_s25 }
 0x234   : > { %883 = vrot.lane.b32.xlu2 %v1906_v19, %s1494_s25  ;;  %s1254_s25 = smul.u32 24, %s1570_s13  ;;  %s379_s13 = scalar_lea.vmem [#allocation11], %s1253_s11 }
 0x235   : > { %867 = vrot.lane.b32.xlu1 %v853_v16, %s1495_s26  ;;  %865 = vrot.lane.b32.xlu0 %v1900_v18, %s1495_s26  ;;  %s1134_s21 = sshll.u32 %s379_s13, 4  ;;  %s1135_s21 = int_to_ptr.vmem [resolvable:$true] %s1134_s21 }
 0x236   : > { %s1132_s24 = scalar_lea.hbm %s2030_s9, %s1254_s25 }
 0x237   : > { %s1136_s27 = sshll.u32 %s1132_s24, 4  ;;  %s1137_s27 = int_to_ptr.hbm [resolvable:$true] %s1136_s27 }
 0x238   : > { %s1424_s29 = sshra.s32 %s1137_s27, 4  ;;  %s1425_s29 = int_to_ptr.hbm [resolvable:$true] %s1424_s29 }
 0x239   : > { %s1426_s28 = scalar_lea.hbm %s1425_s29, 24  ;;  %p1431_p9 = scmp.lt.s32.totalorder %s1425_s29, %s2030_s9 }
 0x23a   : > { %p1427_p1 = scmp.ne.s32.totalorder %s1425_s29, %s1426_s28  ;;  %p1432_p10 = scmp.lt.s32.totalorder %s1430_s15, %s1426_s28 }
 0x23c   : > { %863 = vrot.lane.b32.xlu2 %v1906_v19, %s1495_s26  ;;  %p1428_p4 = pnand %p1427_p1, %p1615_p3  ;;  %p1433_p2 = por %p1432_p10, %p1431_p9 }
 0x23d   : > { %1048 = vperm.xlu0 %1333, %v1045_v21  }
 0x23e   : > { %p1429_p8 = pneg %p1428_p4 }
 0x240   : > { %p1434_p11 = pnand %p1433_p2, %p1429_p8 }
 0x244   : > { %589 = vperm.xlu2 %1334, %v586_v23  }
 0x25e   : > { %v1004_v13 = vpop.permute.xlu2 %1003 }
 0x266   : > { %v984_v25 = vpop.permute.xlu2 %983 }
 0x26e   : > { %v964_v29 = vpop.permute.xlu2 %963 }
 0x26f   : > { %v1008_v26 = vpop.permute.xlu1 %1007  ;;  %v1006_v28 = vpop.permute.xlu0 %1005 }
 0x270   : > { %1016 = vst.msk [vmem:[#allocation3 + $0xd0] sm:$0xff] %vm388_vm0, %v1008_v26  ;;  %v1009_v1 = vsel %vm549_vm1, %v1004_v13, %v1006_v28  ;;  %v1010_v11 = vsel %vm549_vm1, %v1006_v28, %v1008_v26 }
 0x271   : > { %1061 = vmatpush.msrb.mxu2 %v1009_v1  ;;  %1081 = vmatpush.msrb.mxu3 %v1010_v11 }
 0x276   : > { %v944_v33 = vpop.permute.xlu2 %943 }
 0x277   : > { %v988_v20 = vpop.permute.xlu1 %987  ;;  %v1044_v30 = vld [vmem:[#allocation3 + $0xd0] sm:$0xff]  ;;  %v986_v17 = vpop.permute.xlu0 %985 }
 0x278   : > { %996 = vst.msk [vmem:[#allocation3 + $0xb8] sm:$0xff] %vm388_vm0, %v988_v20  ;;  %1101 = vmatpush.msra.mxu0 %v1044_v30  ;;  %v989_v32 = vsel %vm528_vm2, %v984_v25, %v986_v17  ;;  %v990_v27 = vsel %vm528_vm2, %v986_v17, %v988_v20 }
 0x279   : > { %1062 = vmatpush.msrb.mxu2 %v989_v32  ;;  %1082 = vmatpush.msrb.mxu3 %v990_v27 }
 0x27e   : > { %v924_v41 = vpop.permute.xlu2 %923 }
 0x27f   : > { %v968_v34 = vpop.permute.xlu1 %967  ;;  %v1041_v22 = vld [vmem:[#allocation3 + $0xb8] sm:$0xff]  ;;  %v966_v36 = vpop.permute.xlu0 %965 }
 0x280   : > { %976 = vst.msk [vmem:[#allocation3 + $0xa0] sm:$0xff] %vm388_vm0, %v968_v34  ;;  %1102 = vmatpush.msra.mxu0 %v1041_v22  ;;  %v969_v37 = vsel %vm507_vm5, %v964_v29, %v966_v36  ;;  %v970_v35 = vsel %vm507_vm5, %v966_v36, %v968_v34 }
 0x281   : > { %1063 = vmatpush.msrb.mxu2 %v969_v37  ;;  %1083 = vmatpush.msrb.mxu3 %v970_v35 }
 0x286   : > { %v904_v48 = vpop.permute.xlu2 %903 }
 0x287   : > { %v948_v38 = vpop.permute.xlu1 %947  ;;  %v1038_v40 = vld [vmem:[#allocation3 + $0xa0] sm:$0xff]  ;;  %v946_v24 = vpop.permute.xlu0 %945 }
 0x288   : > { %956 = vst.msk [vmem:[#allocation3 + $0x88] sm:$0xff] %vm388_vm0, %v948_v38  ;;  %1103 = vmatpush.msra.mxu0 %v1038_v40  ;;  %v949_v42 = vsel %vm486_vm7, %v944_v33, %v946_v24  ;;  %v950_v31 = vsel %vm486_vm7, %v946_v24, %v948_v38 }
 0x289   : > { %1064 = vmatpush.msrb.mxu2 %v949_v42  ;;  %1084 = vmatpush.msrb.mxu3 %v950_v31 }
 0x28e   : > { %v884_v53 = vpop.permute.xlu2 %883 }
 0x28f   : > { %v928_v39 = vpop.permute.xlu1 %927  ;;  %v1035_v43 = vld [vmem:[#allocation3 + $0x88] sm:$0xff]  ;;  %v926_v44 = vpop.permute.xlu0 %925 }
 0x290   : > { %936 = vst.msk [vmem:[#allocation3 + $0x70] sm:$0xff] %vm388_vm0, %v928_v39  ;;  %1104 = vmatpush.msra.mxu0 %v1035_v43  ;;  %v929_v45 = vsel %vm465_vm9, %v924_v41, %v926_v44  ;;  %v930_v46 = vsel %vm465_vm9, %v926_v44, %v928_v39 }
 0x291   : > { %1065 = vmatpush.msrb.mxu2 %v929_v45  ;;  %1085 = vmatpush.msrb.mxu3 %v930_v46 }
 0x296   : > { %v864_v59 = vpop.permute.xlu2 %863 }
 0x297   : > { %v908_v15 = vpop.permute.xlu1 %907  ;;  %v1032_v2 = vld [vmem:[#allocation3 + $0x70] sm:$0xff]  ;;  %v906_v50 = vpop.permute.xlu0 %905 }
 0x298   : > { %916 = vst.msk [vmem:[#allocation3 + $0x58] sm:$0xff] %vm388_vm0, %v908_v15  ;;  %1105 = vmatpush.msra.mxu0 %v1032_v2  ;;  %v909_v51 = vsel %vm444_vm11, %v904_v48, %v906_v50  ;;  %v910_v52 = vsel %vm444_vm11, %v906_v50, %v908_v15 }
 0x299   : > { %1066 = vmatpush.msrb.mxu2 %v909_v51  ;;  %1086 = vmatpush.msrb.mxu3 %v910_v52 }
 0x29e   : > { %v590_v7 = vpop.permute.xlu2 %589 }
 0x29f   : > { %v888_v54 = vpop.permute.xlu1 %887  ;;  %v1029_v55 = vld [vmem:[#allocation3 + $0x58] sm:$0xff]  ;;  %v886_v56 = vpop.permute.xlu0 %885  ;;  %v614_v12 = vadd.f32 %v1896_v47, %v590_v7  ;;  %v634_v14 = vadd.f32 %v1898_v49, %v590_v7  ;;  %v654_v21 = vadd.f32 %v653_v6, %v590_v7 }
 0x2a0   : > { %896 = vst.msk [vmem:[#allocation3 + $0x40] sm:$0xff] %vm388_vm0, %v888_v54  ;;  %1106 = vmatpush.msra.mxu0 %v1029_v55  ;;  %v889_v57 = vsel %vm423_vm14, %v884_v53, %v886_v56  ;;  %v890_v58 = vsel %vm423_vm14, %v886_v56, %v888_v54 }
 0x2a1   : > { %1067 = vmatpush.msrb.mxu2 %v889_v57  ;;  %1087 = vmatpush.msrb.mxu3 %v890_v58 }
 0x2a7   : > { %v868_v60 = vpop.permute.xlu1 %867  ;;  %v1026_v61 = vld [vmem:[#allocation3 + $0x40] sm:$0xff]  ;;  %v866_v62 = vpop.permute.xlu0 %865 }
 0x2a8   : > { %876 = vst.msk [vmem:[#allocation3 + $0x28] sm:$0xff] %vm388_vm0, %v868_v60  ;;  %1107 = vmatpush.msra.mxu0 %v1026_v61  ;;  %v869_v63 = vsel %vm402_vm3, %v864_v59, %v866_v62  ;;  %v870_v0 = vsel %vm402_vm3, %v866_v62, %v868_v60 }
 0x2a9   : > { %1068 = vmatpush.msrb.mxu2 %v869_v63  ;;  %1088 = vmatpush.msrb.mxu3 %v870_v0 }
 0x2ab   : > { %1069 = vmatpush.msrb.mxu2 %v1906_v19  ;;  %1089 = vmatpush.msrb.mxu3 %v1900_v18 }
 0x2ac   : > { %1245 = vmatmul.msk.f32.vlgmr.msrb.gmra.mxu2 %vm592_vm13, %v1017_v3  ;;  %1246 = vmatmul.msk.f32.vlgmr.msrb.gmra.mxu3 %vm592_vm13, %v1017_v3 }
 0x2af   : > { %v1023_v4 = vld [vmem:[#allocation3 + $0x28] sm:$0xff]  ;;  %v1049_v8 = vpop.permute.xlu0 %1048 }
 0x2b0   : > { %1108 = vmatpush.msra.mxu0 %v1023_v4 }
 0x2b2   : > { %1109 = vmatpush.msra.mxu0 %v1020_v5 }
 0x2b3   : > { %1247 = vmatmul.msk.f32.vlgmr.msra.gmra.mxu0 %vm592_vm13, %v1017_v3 }
 0x32f   : > { %v1071_v9 = vpop.f32.mrf.mxu2  ;;  %v1091_v10 = vpop.f32.mrf.mxu3 }
 0x330   : > { %v1111_v16 = vpop.f32.mrf.mxu0  ;;  %v1072_v18 = vadd.f32 %v1071_v9, %v1049_v8  ;;  %v1092_v19 = vadd.f32 %v1091_v10, %v1049_v8 }
 0x331   : > { %v1112_v23 = vadd.f32 %v1111_v16, %v1049_v8 }
 0x332   : > { %v1114_v13 = vadd.f32 %v1072_v18, %v614_v12  ;;  %v1115_v25 = vadd.f32 %v1092_v19, %v634_v14 }
 0x333   : > { %v1116_v26 = vadd.f32 %v1112_v23, %v654_v21 }
 0x334   : > { %1117 = vst [vmem:[%s379_s13] sm:$0xff] %v1114_v13 }
 0x335   : > { %1119 = vst.msk [vmem:[%s379_s13 + $0x10] sm:$0xff] %vm388_vm0, %v1116_v26 }
 0x336   : > { %1118 = vst [vmem:[%s379_s13 + $0x8] sm:$0xff] %v1115_v25 }
 0x337   : > { %1437 = shalt.err (!%p1434_p11)
}
 0x338   : > { %1265 = dma.vmem_to_hbm [thread:$0]  (%p1615_p3), %s1135_s21, 384, %s1137_s27, %s1121_s2  }
 0x339 PF: > { %s1148_s18 = sand.u32 1, %s1472_s30   ;;  %p2046_p12 = scmp.ge.s32.totalorder %s1484_s12, 2 }
 0x33a   : > { %s1149_s19 = scalar_lea.sflag [#allocation6], %s1148_s18 }
 0x33b   : > { %p1279_p13 = pnand %p2046_p12, %p1584_p6 }
 0x33d   : > { %p1280_p0 = pneg %p1279_p13 }
 0x33f   : > { %1467 = dma.done.wait (%p1280_p0), %s1149_s19, 384  }
 0x340   : > { %1469 = vsyncadd (%p1280_p0), %s1149_s19, 4294966912  ;;  %s2047_s12 = sld [smem:[#allocation17_spill]]  ;;  %s2050_s30 = smov %s1476_s10 }
 0x341   : > { %s2048_s22 = sld [smem:[#allocation16_spill]] }
 0x342   : > { %s2049_s11 = sld [smem:[#allocation18_spill]] }
 0x346   : > { %p24_p5 = scmp.ge.s32.totalorder %s2047_s12, 4  }
 0x347   : > { %s2051_s10 = smov %s2048_s22 }
 0x348   :  { %26 = sbr.rel (!%p24_p5) target bundleno = 10 (0xa), region = 110 }
 0x34d   :  { %1155 = vsyncpa [#allocation5], 1 }
 0x34e   :  { %1157 = vsyncpa [#allocation5 + $0x1], 1 }
 0x34f   :  { %1158 = vsyncpa [#allocation10], 1 }
 0x350   :  { %1159 = vsyncpa [#allocation6], 1 }
 0x351   :  { %1161 = vsyncpa [#allocation6 + $0x1], 1 }
 0x352   :  { %1162 = vsyncpa [#allocation7], 1 }
 0x353   :  { %1164 = vsyncpa [#allocation7 + $0x1], 1 }

</bundles_post_ra>
